<compile_context>
chip_gen: v7x
topology: tpu7x:2x2x1
jax: 0.10.0
libtpu: 0.0.40
codegen_flags: <defaults>
</compile_context>

<pallas_src>
import functools
import math

import jax
import jax.numpy as jnp
from jax.experimental import pallas as pl
from jax.experimental.pallas import tpu as pltpu

MINVAR = -3.0
MAXVAR = -2.0
LANES = 128


def _triple(v):
    if isinstance(v, (tuple, list)):
        assert len(v) == 3
        return tuple(int(i) for i in v)
    return (int(v),) * 3


def _round_up(x, m):
    return ((x + m - 1) // m) * m


# ----------------------------- Pallas kernels -----------------------------

def _sample_kl_kernel(mu_ref, logsig_ref, z_ref, w_ref, kl_ref, *,
                      prior_mu, prior_logsigmasq):
    # Fused: reparameterized sample + closed-form Gaussian KL reduction.
    #   w  = mu + exp(0.5 * logsigmasq) * z      (z = r * eps/||eps||, precomputed)
    #   kl = sum 0.5*(qls - pls + (exp(pls) + (pm - qm)^2) * exp(-qls) - 1)
    # Prior is a scalar (non-mixed path) -> folded in as compile-time constants
    # (no extra HBM reads for the constant prior tensors).
    mu = mu_ref[...]
    ls = logsig_ref[...]
    w_ref[...] = mu + jnp.exp(0.5 * ls) * z_ref[...]
    term = 0.5 * (prior_logsigmasq - ls
                  + (jnp.exp(ls) + (mu - prior_mu) ** 2) * jnp.exp(-prior_logsigmasq)
                  - 1.0)
    kl_ref[...] = jnp.reshape(jnp.sum(term), (1, 1))


def _im2col_matmul_kernel(a_ref, b_ref, o_ref):
    # a_ref: (TM, K)  bf16 im2col patches  (K = kD*kH*kW*Cin folded contraction dim)
    # b_ref: (K, CN)  bf16 folded, flipped, channel-swapped taps (CN = Cout padded to 128)
    # o_ref: (TM, CN) f32 lane-dense output tile -> unmasked stores, single MXU matmul.
    # TODO(synk): tile K in <=512 chunks with a VMEM accumulator if kD*kH*kW*Cin grows large.
    o_ref[...] = jnp.dot(a_ref[...], b_ref[...], preferred_element_type=jnp.float32)


# ----------------------------- Module wrapper -----------------------------

class ConvTranspose3dPallas:
    """Bayesian transposed 3D convolution with Radial posterior (Pallas TPU forward)."""

    def __init__(self, in_channels, out_channels, kernel_size, stride=1, padding=0,
                 groups=1, dilation=1, bias=False, activation=None,
                 prior_mu=0.0, prior_logsigmasq=0.0, n_mc_iter=20,
                 key=None):
        assert groups == 1, "groups != 1 not implemented"  # TODO(synk): grouped transposed conv
        assert not bias, "bias=False is the module default; bias path not implemented"
        self.in_channels = in_channels
        self.out_channels = out_channels
        self.kernel_size = _triple(kernel_size)
        self.stride = _triple(stride)
        self.padding = _triple(padding)
        self.dilation = _triple(dilation)
        self.groups = groups
        self.activation = activation
        self.n_mc_iter = n_mc_iter
        self.prior_mu_val = float(prior_mu)
        self.prior_logsigmasq_val = float(prior_logsigmasq)

        if key is None:
            key = jax.random.PRNGKey(0)
        k_mu, k_ls = jax.random.split(key)

        # reset_parameters(): post_mu ~ U(-stdv, stdv), post_logsigmasq ~ U(minvar, maxvar)
        n = in_channels
        for k in self.kernel_size:
            n *= k
        stdv = 1.0 / math.sqrt(n)
        wshape = (in_channels, out_channels // groups) + self.kernel_size
        self.post_mu = jax.random.uniform(k_mu, wshape, jnp.float32, -stdv, stdv)
        self.post_logsigmasq = jax.random.uniform(k_ls, wshape, jnp.float32, MINVAR, MAXVAR)

        # reset_priors() (is_mixed_prior=False path): constant prior tensors kept for API
        # parity; the kernels use the scalar values directly.
        self.prior_mu = jnp.full(wshape, self.prior_mu_val, jnp.float32)
        self.prior_logsigmasq = jnp.full(wshape, self.prior_logsigmasq_val, jnp.float32)

        self._last_weight = None  # stored for external sanity checks

    # ----------------------------------------------------------------------
    def __call__(self, x, key):
        Cin, Cout = self.in_channels, self.out_channels
        kD, kH, kW = self.kernel_size
        sd, sh, sw = self.stride
        pd, ph, pw = self.padding
        dd, dh, dw = self.dilation
        wshape = self.post_mu.shape
        P = Cin * Cout * kD * kH * kW

        # ----- Radial posterior sample: w = mu + sigma * r * eps/||eps|| -----
        eps_key, r_key = jax.random.split(key)
        eps = jax.random.normal(eps_key, wshape, jnp.float32)
        eps_dir = eps / jnp.sqrt(jnp.sum(eps * eps))
        r = jax.random.normal(r_key, (), jnp.float32)
        z = eps_dir * r

        # Lane-dense packing of the flattened weight: pad to a multiple of 128 and
        # reshape to (rows, 128).  Padding mu with prior_mu and logsigmasq with
        # prior_logsigmasq makes the padded KL terms exactly zero.
        Ppad = _round_up(P, LANES)
        rows = Ppad // LANES

        def _pack(a, fill):
            flat = a.reshape(-1)
            pad = jnp.full((Ppad - P,), fill, flat.dtype)
            return jnp.concatenate([flat, pad]).reshape(rows, LANES)

        mu_p = _pack(self.post_mu, self.prior_mu_val)
        ls_p = _pack(self.post_logsigmasq, self.prior_logsigmasq_val)
        z_p = _pack(z, 0.0)

        # ----- fused sample + KL (single pallas_call, one pass over mu/logsigmasq) -----
        # TODO(synk): vip.Radial uses an MC estimate of the KL for the radial density;
        #             closed-form Gaussian KL is used here as the deterministic equivalent.
        sample_kl_call = pl.pallas_call(
            functools.partial(_sample_kl_kernel,
                              prior_mu=self.prior_mu_val,
                              prior_logsigmasq=self.prior_logsigmasq_val),
            out_shape=(jax.ShapeDtypeStruct((rows, LANES), jnp.float32),
                       jax.ShapeDtypeStruct((1, 1), jnp.float32)),
            in_specs=[pl.BlockSpec(memory_space=pltpu.MemorySpace.VMEM)] * 3,
            out_specs=(pl.BlockSpec(memory_space=pltpu.MemorySpace.VMEM),
                       pl.BlockSpec(memory_space=pltpu.MemorySpace.VMEM)),
        )
        w_packed, kl2d = sample_kl_call(mu_p, ls_p, z_p)
        w = w_packed.reshape(-1)[:P].reshape(wshape)
        kl = kl2d[0, 0]
        self._last_weight = w

        # ----- conv_transpose3d: im2col pack (JAX glue) + Pallas folded matmul -----
        # NCDHW -> NDHWC (channels on lanes for the pack)
        x_ndhwc = jnp.transpose(x, (0, 2, 3, 4, 1))
        N, Di, Hi, Wi, _ = x_ndhwc.shape

        # zero-dilate the input by the transposed-conv stride (glue)
        # TODO(synk): replace materialized zero-dilation with stride^3 phase decomposition
        #             (sub-pixel convs) to avoid feeding zeros to the MXU when stride > 1.
        Dd, Hd, Wd = (Di - 1) * sd + 1, (Hi - 1) * sh + 1, (Wi - 1) * sw + 1
        if (sd, sh, sw) != (1, 1, 1):
            xz = jnp.zeros((N, Dd, Hd, Wd, Cin), x_ndhwc.dtype)
            xz = xz.at[:, ::sd, ::sh, ::sw, :].set(x_ndhwc)
        else:
            xz = x_ndhwc

        ped, peh, pew = dd * (kD - 1) - pd, dh * (kH - 1) - ph, dw * (kW - 1) - pw
        if min(ped, peh, pew) < 0:
            raise ValueError(
                "ConvTranspose3dPallas: padding > dilation*(kernel_size-1) not supported")
        xp = jnp.pad(xz, ((0, 0), (ped, ped), (peh, peh), (pew, pew), (0, 0)))
        xp = xp.astype(jnp.bfloat16)  # bf16 conv inputs, f32 accumulation in the kernel
        Do = Dd + 2 * ped - dd * (kD - 1)
        Ho = Hd + 2 * peh - dh * (kH - 1)
        Wo = Wd + 2 * pew - dw * (kW - 1)

        # im2col: one shifted slab per tap, stacked so K = (kd, kh, kw, cin) is the
        # folded (lane-dense) contraction dimension.
        taps = []
        for kd in range(kD):
            for kh in range(kH):
                for kw in range(kW):
                    taps.append(xp[:, dd * kd:dd * kd + Do,
                                   dh * kh:dh * kh + Ho,
                                   dw * kw:dw * kw + Wo, :])
        K = kD * kH * kW * Cin
        M = N * Do * Ho * Wo
        patches = jnp.stack(taps, axis=-2).reshape(M, K)          # (M, K) bf16

        # folded, spatially-flipped, channel-swapped taps: (K, Cout), same (kd,kh,kw,cin) order
        w_taps = jnp.transpose(w[:, :, ::-1, ::-1, ::-1], (2, 3, 4, 0, 1))
        w2d = w_taps.reshape(K, Cout).astype(jnp.bfloat16)

        # Pad M to the M-tile and Cout to a full 128-lane width (unmasked stores).
        TM = 256
        CN = _round_up(Cout, LANES)
        M_pad = _round_up(M, TM)
        a = jnp.pad(patches, ((0, M_pad - M), (0, 0)))
        b = jnp.pad(w2d, ((0, 0), (0, CN - Cout)))

        conv_call = pl.pallas_call(
            _im2col_matmul_kernel,
            out_shape=jax.ShapeDtypeStruct((M_pad, CN), jnp.float32),
            grid=(M_pad // TM,),
            in_specs=[
                pl.BlockSpec((TM, K), lambda i: (i, 0)),
                pl.BlockSpec((K, CN), lambda i: (0, 0)),
            ],
            out_specs=pl.BlockSpec((TM, CN), lambda i: (i, 0)),
            compiler_params=pltpu.CompilerParams(
                dimension_semantics=("parallel",)),
        )
        out2d = conv_call(a, b)                                    # (M_pad, CN) f32

        out = out2d[:M, :Cout].reshape(N, Do, Ho, Wo, Cout)
        out = jnp.transpose(out, (0, 4, 1, 2, 3))                  # -> NCDHW

        if self.activation is not None:
            out = self.activation(out)
        return out, kl


# ----------------------------------- main -----------------------------------

if __name__ == "__main__":
    root = jax.random.PRNGKey(0)
    k_init, k_x, k_sample = jax.random.split(root, 3)

    in_channels, out_channels, ksize = 4, 8, 3
    layer = ConvTranspose3dPallas(in_channels, out_channels, ksize,
                                  stride=1, padding=0, dilation=1, key=k_init)

    # x layout: NCDHW (PyTorch convention)
    x = jax.random.normal(k_x, (2, in_channels, 5, 5, 5), jnp.float32)

    out, kl = layer(x, k_sample)
    out = jax.block_until_ready(out)
    kl = jax.block_until_ready(kl)

    # --- sanity check against XLA's conv_general_dilated (independent f32 reference) ---
    w = layer._last_weight  # (Cin, Cout, kD, kH, kW), f32
    kD, kH, kW = layer.kernel_size
    dd, dh, dw = layer.dilation
    pd, ph, pw = layer.padding
    pad = [(dd * (kD - 1) - pd,) * 2, (dh * (kH - 1) - ph,) * 2, (dw * (kW - 1) - pw,) * 2]
    w_oidhw = jnp.transpose(w[:, :, ::-1, ::-1, ::-1], (1, 0, 2, 3, 4))
    ref = jax.lax.conv_general_dilated(
        x, w_oidhw, window_strides=(1, 1, 1), padding=pad,
        lhs_dilation=layer.stride, rhs_dilation=layer.dilation,
        dimension_numbers=("NCDHW", "OIDHW", "NCDHW"))
    ref = jax.block_until_ready(ref)

    assert out.shape == ref.shape == (2, out_channels, 7, 7, 7), (out.shape, ref.shape)
    rel_err = float(jnp.max(jnp.abs(out - ref)) / (jnp.max(jnp.abs(ref)) + 1e-6))
    assert rel_err < 5e-2, f"conv_transpose3d mismatch, rel_err={rel_err}"

    # --- KL check against closed-form Gaussian KL computed in plain JAX ---
    kl_ref = jnp.sum(0.5 * (layer.prior_logsigmasq - layer.post_logsigmasq
                            + (jnp.exp(layer.post_logsigmasq)
                               + (layer.post_mu - layer.prior_mu) ** 2)
                            * jnp.exp(-layer.prior_logsigmasq) - 1.0))
    assert bool(jnp.isfinite(kl)), "KL is not finite"
    assert abs(float(kl - kl_ref)) < 1e-3 * max(1.0, abs(float(kl_ref))), (kl, kl_ref)

    print("KERNEL_OK")
</pallas_src>

<mosaic_0001>
module attributes {stable_mosaic.version = 11 : i64} {
  func.func @_sample_kl_kernel(%arg0: memref<7x128xf32, #tpu.memory_space<vmem>>, %arg1: memref<7x128xf32, #tpu.memory_space<vmem>>, %arg2: memref<7x128xf32, #tpu.memory_space<vmem>>, %arg3: memref<7x128xf32, #tpu.memory_space<vmem>>, %arg4: memref<1x1xf32, #tpu.memory_space<vmem>>) attributes {dimension_semantics = [], scalar_prefetch = 0 : i64, scratch_operands = 0 : i64, tpu.core_type = #tpu.core_type<tc>} {
    %c0 = arith.constant 0 : index
    %c0_0 = arith.constant 0 : index
    %0 = vector.load %arg0[%c0, %c0_0] : memref<7x128xf32, #tpu.memory_space<vmem>>, vector<7x128xf32>
    %c0_1 = arith.constant 0 : index
    %c0_2 = arith.constant 0 : index
    %1 = vector.load %arg1[%c0_1, %c0_2] : memref<7x128xf32, #tpu.memory_space<vmem>>, vector<7x128xf32>
    %cst = arith.constant 5.000000e-01 : f32
    %2 = vector.broadcast %cst : f32 to vector<7x128xf32>
    %3 = arith.mulf %2, %1 : vector<7x128xf32>
    %4 = math.exp %3 : vector<7x128xf32>
    %c0_3 = arith.constant 0 : index
    %c0_4 = arith.constant 0 : index
    %5 = vector.load %arg2[%c0_3, %c0_4] : memref<7x128xf32, #tpu.memory_space<vmem>>, vector<7x128xf32>
    %6 = arith.mulf %4, %5 : vector<7x128xf32>
    %7 = arith.addf %0, %6 : vector<7x128xf32>
    %c0_5 = arith.constant 0 : index
    %c0_6 = arith.constant 0 : index
    %8 = vector.load %arg3[%c0_5, %c0_6] : memref<7x128xf32, #tpu.memory_space<vmem>>, vector<7x128xf32>
    tpu.vector_store %arg3[%c0_5, %c0_6], %7 {strides = array<i32>} : memref<7x128xf32, #tpu.memory_space<vmem>>, vector<7x128xf32>,
    %cst_7 = arith.constant 0.000000e+00 : f32
    %9 = vector.broadcast %cst_7 : f32 to vector<7x128xf32>
    %10 = arith.subf %9, %1 : vector<7x128xf32>
    %11 = math.exp %1 : vector<7x128xf32>
    %cst_8 = arith.constant 0.000000e+00 : f32
    %12 = vector.broadcast %cst_8 : f32 to vector<7x128xf32>
    %13 = arith.subf %0, %12 : vector<7x128xf32>
    %14 = arith.mulf %13, %13 : vector<7x128xf32>
    %15 = arith.addf %11, %14 : vector<7x128xf32>
    %cst_9 = arith.constant -0.000000e+00 : f32
    %16 = math.exp %cst_9 : f32
    %17 = vector.broadcast %16 : f32 to vector<7x128xf32>
    %18 = arith.mulf %15, %17 : vector<7x128xf32>
    %19 = arith.addf %10, %18 : vector<7x128xf32>
    %cst_10 = arith.constant 1.000000e+00 : f32
    %20 = vector.broadcast %cst_10 : f32 to vector<7x128xf32>
    %21 = arith.subf %19, %20 : vector<7x128xf32>
    %cst_11 = arith.constant 5.000000e-01 : f32
    %22 = vector.broadcast %cst_11 : f32 to vector<7x128xf32>
    %23 = arith.mulf %22, %21 : vector<7x128xf32>
    %24 = vector.shape_cast %23 : vector<7x128xf32> to vector<1x7x128xf32>
    %cst_12 = arith.constant dense<0.000000e+00> : vector<1xf32>
    %25 = vector.multi_reduction <add>, %24, %cst_12 [1, 2] : vector<1x7x128xf32> to vector<1xf32>
    %26 = vector.shape_cast %25 : vector<1xf32> to vector<1x1x1xf32>
    %27 = vector.extract %26[0, 0, 0] : f32 from vector<1x1x1xf32>
    %28 = vector.broadcast %27 : f32 to vector<1x1xf32>
    %c0_13 = arith.constant 0 : index
    %c0_14 = arith.constant 0 : index
    %29 = vector.load %arg4[%c0_13, %c0_14] : memref<1x1xf32, #tpu.memory_space<vmem>>, vector<1x1xf32>
    tpu.vector_store %arg4[%c0_13, %c0_14], %28 {strides = array<i32>} : memref<1x1xf32, #tpu.memory_space<vmem>>, vector<1x1xf32>,
    return
  }
}

</mosaic_0001>

<bundles_post_ra>
// kernel: tpu_custom_call.1
= control target key start
LH: loop header
LB: loop body
LE: loop exit
PB: predicated region body
PF: predicated region fallthrough
CT: control target
= control target key end

     0   :  { %10 = vsyncpa [#allocation3], 0  ;;  %s334_s0 = inlined_call_operand.hbm [shape: f32[7,128], index: 0, kind: input, shape index: {}]   ;;  %s335_s1 = inlined_call_operand.hbm [shape: f32[7,128], index: 1, kind: input, shape index: {}]   ;;  %s336_s2 = inlined_call_operand.hbm [shape: f32[7,128], index: 2, kind: input, shape index: {}]   ;;  %s337_s3 = inlined_call_operand.hbm [shape: f32[7,128], index: 3, kind: output, shape index: {0}]   ;;  %s338_s4 = inlined_call_operand.hbm [shape: f32[1,1], index: 4, kind: output, shape index: {1}]  }
   0x1   :  { %11 = vsyncpa [#allocation6], 0 }
   0x2   :  { %12 = vsyncpa [#allocation4], 0 }
   0x3   :  { %13 = vsyncpa [#allocation10], 0  ;;  %s244_s15 = smov [#allocation5]   ;;  %s245_s17 = smov [#allocation2]  }
   0x4   :  { %s30_s16 = sshll.u32 %s244_s15, 4  ;;  %s20_s18 = sshll.u32 %s245_s17, 4  ;;  %s31_s16 = int_to_ptr.vmem [resolvable:$true] %s30_s16  ;;  %s21_s18 = int_to_ptr.vmem [resolvable:$true] %s20_s18 }
   0x5   :  { %s126_s21 = scalar_lea.hbm %s335_s1, 128 }
   0x6   :  { %p127_p0 = scmp.ne.s32.totalorder %s335_s1, %s126_s21  ;;  %p130_p1 = scmp.lt.u32.totalorder %s126_s21, %s335_s1 }
   0x8   :  { %p132_p2 = pnand %p130_p1, %p127_p0 }
   0xa   :  { %135 = shalt.err (!%p132_p2)
}
   0xb   :  { %s136_s26 = scalar_lea.vmem %s31_s16, 128  ;;  %p141_p4 = scmp.lt.s32.totalorder %s31_s16, %s31_s16 }
   0xc   :  { %p137_p3 = scmp.ne.s32.totalorder %s31_s16, %s136_s26  ;;  %p142_p5 = scmp.lt.s32.totalorder %s136_s26, %s136_s26 }
   0xe   :  { %p143_p6 = por %p142_p5, %p141_p4 }
  0x10   :  { %p144_p7 = pnand %p143_p6, %p137_p3 }
  0x12   :  { %147 = shalt.err (!%p144_p7)
}
  0x13   :  { %33 = dma.hbm_to_vmem [thread:$0]  %s335_s1, 128, %s31_s16, [#allocation6]  }
  0x14   :  { %s148_s5 = scalar_lea.hbm %s334_s0, 128 }
  0x15   :  { %p149_p8 = scmp.ne.s32.totalorder %s334_s0, %s148_s5  ;;  %p152_p9 = scmp.lt.u32.totalorder %s148_s5, %s334_s0 }
  0x17   :  { %p154_p10 = pnand %p152_p9, %p149_p8 }
  0x19   :  { %157 = shalt.err (!%p154_p10)
}
  0x1a   :  { %s158_s10 = scalar_lea.vmem %s21_s18, 128  ;;  %p163_p12 = scmp.lt.s32.totalorder %s21_s18, %s21_s18 }
  0x1b   :  { %p159_p11 = scmp.ne.s32.totalorder %s21_s18, %s158_s10  ;;  %p164_p13 = scmp.lt.s32.totalorder %s158_s10, %s158_s10 }
  0x1d   :  { %p165_p0 = por %p164_p13, %p163_p12 }
  0x1f   :  { %p166_p1 = pnand %p165_p0, %p159_p11 }
  0x21   :  { %169 = shalt.err (!%p166_p1)
}
  0x22   :  { %23 = dma.hbm_to_vmem [thread:$0]  %s334_s0, 128, %s21_s18, [#allocation3]  }
  0x23   :  { %s246_s12 = smov [#allocation7]   ;;  %s170_s16 = scalar_lea.hbm %s336_s2, 128 }
  0x24   :  { %s40_s13 = sshll.u32 %s246_s12, 4  ;;  %p171_p2 = scmp.ne.s32.totalorder %s336_s2, %s170_s16  ;;  %s41_s13 = int_to_ptr.vmem [resolvable:$true] %s40_s13 }
  0x25   :  { %p174_p3 = scmp.lt.u32.totalorder %s170_s16, %s336_s2 }
  0x27   :  { %p176_p4 = pnand %p174_p3, %p171_p2 }
  0x29   :  { %179 = shalt.err (!%p176_p4)
}
  0x2a   :  { %s180_s22 = scalar_lea.vmem %s41_s13, 128  ;;  %p185_p6 = scmp.lt.s32.totalorder %s41_s13, %s41_s13 }
  0x2b   :  { %p181_p5 = scmp.ne.s32.totalorder %s41_s13, %s180_s22  ;;  %p186_p7 = scmp.lt.s32.totalorder %s180_s22, %s180_s22 }
  0x2d   :  { %p187_p8 = por %p186_p7, %p185_p6 }
  0x2f   :  { %p188_p9 = pnand %p187_p8, %p181_p5 }
  0x31   :  { %191 = shalt.err (!%p188_p9)
}
  0x32   :  { %43 = dma.hbm_to_vmem [thread:$0]  %s336_s2, 128, %s41_s13, [#allocation6]  }
  0x33   :  { %236 = dma.done.wait [#allocation3], 128  }
  0x34   :  { %237 = vsyncadd [#allocation3], 4294967168 }
  0x35   :  { %238 = dma.done.wait [#allocation6], 256  }
  0x36   :  { %239 = vsyncadd [#allocation6], 4294967040  ;;  %v54_v0 = vld [vmem:[#allocation5] sm:$0x7f]  ;;  %v53_v2 = vld [vmem:[#allocation2] sm:$0x7f] }
  0x37   :  { %v63_v1 = vmul.f32 1.442695, %v54_v0  ;;  %v65_v3 = vmul.f32 %v53_v2, %v53_v2  ;;  %v62_v4 = vsub.f32 0.0, %v54_v0  ;;  %vm70_vm0 = vcmask 1046528   ;;  %v58_v14 = vld [vmem:[#allocation7] sm:$0x7f] }
  0x38   :  { %v55_v11 = vmul.f32 0.5, %v54_v0  ;;  %s247_s2 = smov [#allocation8]  }
  0x39   :  { %122 = vpow2.f32 %v63_v1  ;;  %s90_s23 = sshll.u32 %s247_s2, 4  ;;  %s91_s23 = int_to_ptr.vmem [resolvable:$true] %s90_s23 }
  0x3a   :  { %v56_v12 = vmul.f32 1.442695, %v55_v11  ;;  %s192_s24 = scalar_lea.vmem %s91_s23, 128  ;;  %p197_p11 = scmp.lt.s32.totalorder %s91_s23, %s91_s23 }
  0x3b   :  { %p193_p10 = scmp.ne.s32.totalorder %s91_s23, %s192_s24  ;;  %p198_p12 = scmp.lt.s32.totalorder %s192_s24, %s192_s24 }
  0x3c   :  { %124 = vpow2.f32 %v56_v12 }
  0x3d   :  { %p199_p13 = por %p198_p12, %p197_p11 }
  0x3f   :  { %p200_p0 = pnand %p199_p13, %p193_p10 }
  0x43   :  { %v123_v5 = vpop.eup %122 }
  0x44   :  { %v66_v6 = vadd.f32 %v123_v5, %v65_v3 }
  0x46   :  { %v67_v7 = vadd.f32 %v66_v6, %v62_v4  ;;  %v125_v13 = vpop.eup %124 }
  0x47   :  { %v59_v15 = vmul.f32 %v125_v13, %v58_v14 }
  0x48   :  { %v114_v8 = vadd.f32 -1.0, %v67_v7 }
  0x49   :  { %v60_v16 = vadd.f32 %v59_v15, %v53_v2 }
  0x4a   :  { %v69_v9 = vmul.f32 0.5, %v114_v8 }
  0x4b   :  { %61 = vst [vmem:[#allocation8] sm:$0x7f] %v60_v16 }
  0x4c   :  { %v71_v10 = vsel %vm70_vm0, %v69_v9, 0.0 }
  0x4d   :  { %72 = vadd.xlane.f32.xlu0 %v71_v10 }
  0x4e   :  { %203 = shalt.err (!%p200_p0)
}
  0x4f   :  { %s204_s27 = scalar_lea.hbm %s337_s3, 128 }
  0x50   :  { %p205_p1 = scmp.ne.s32.totalorder %s337_s3, %s204_s27  ;;  %p208_p2 = scmp.lt.u32.totalorder %s204_s27, %s337_s3 }
  0x52   :  { %p210_p3 = pnand %p208_p2, %p205_p1 }
  0x54   :  { %213 = shalt.err (!%p210_p3)
}
  0x55   :  { %93 = dma.vmem_to_hbm [thread:$0]  %s91_s23, 128, %s337_s3, [#allocation4]   ;;  %vm82_vm1 = vcmask 0  }
  0x56   :  { %s248_s8 = smov [#allocation9]  }
  0x57   :  { %s100_s9 = sshll.u32 %s248_s8, 4  ;;  %s101_s9 = int_to_ptr.vmem [resolvable:$true] %s100_s9 }
  0x58   :  { %s214_s1 = scalar_lea.vmem %s101_s9, 16  ;;  %s218_s11 = scalar_lea.vmem %s101_s9, 32 }
  0x59   :  { %p215_p4 = scmp.ne.s32.totalorder %s101_s9, %s214_s1  ;;  %p219_p5 = scmp.lt.s32.totalorder %s101_s9, %s101_s9 }
  0x5a   :  { %p220_p6 = scmp.lt.s32.totalorder %s218_s11, %s214_s1 }
  0x5c   :  { %p221_p7 = por %p220_p6, %p219_p5 }
  0x5e   :  { %p222_p8 = pnand %p221_p7, %p215_p4 }
  0xda   :  { %v73_v17 = vpop.xlane.xlu0 %72 }
  0xdb   :  { %v74_v18 = vrot.slane %v73_v17, 4 }
  0xdd   :  { %v75_v19 = vadd.f32 %v74_v18, %v73_v17 }
  0xdf   :  { %v76_v20 = vrot.slane %v75_v19, 2 }
  0xe1   :  { %v77_v21 = vadd.f32 %v76_v20, %v75_v19 }
  0xe3   :  { %v78_v22 = vrot.slane %v77_v21, 1 }
  0xe5   :  { %v79_v23 = vadd.f32 %v78_v22, %v77_v21 }
  0xe7   :  { %115 = vpush %v79_v23 }
 0x118   :  { %s116_s10 = spop %115 }
 0x119   :  { %v81_v24 = vstv %s116_s10 }
 0x11a   :  { %83 = vst.msk [vmem:[#allocation9] sm:$0x1] %vm82_vm1, %v81_v24 }
 0x11b   :  { %225 = shalt.err (!%p222_p8)
}
 0x11c   :  { %s226_s13 = scalar_lea.hbm %s338_s4, 16 }
 0x11d   :  { %p227_p9 = scmp.ne.s32.totalorder %s338_s4, %s226_s13  ;;  %p230_p10 = scmp.lt.u32.totalorder %s226_s13, %s338_s4 }
 0x11f   :  { %p232_p11 = pnand %p230_p10, %p227_p9 }
 0x121   :  { %235 = shalt.err (!%p232_p11)
}
 0x122   :  { %103 = dma.vmem_to_hbm [thread:$0]  %s101_s9, 16, %s338_s4, [#allocation10]  }
 0x123   :  { %240 = dma.done.wait [#allocation4], 128  }
 0x124   :  { %241 = vsyncadd [#allocation4], 4294967168 }
 0x125   :  { %242 = dma.done.wait [#allocation10], 16  }
 0x126   :  { %243 = vsyncadd [#allocation10], 4294967280 }
 0x127   :  { %110 = vsyncpa [#allocation3], 1 }
 0x128   :  { %111 = vsyncpa [#allocation6], 1 }
 0x129   :  { %112 = vsyncpa [#allocation4], 1 }
 0x12a   :  { %113 = vsyncpa [#allocation10], 1 }

</bundles_post_ra>
